<compile_context>
chip_gen: v7x
topology: tpu7x:2x2x1
jax: 0.10.0
libtpu: 0.0.40
codegen_flags: <defaults>
</compile_context>

<pallas_src>
import functools

import jax
import jax.numpy as jnp
from jax import lax
from jax.experimental import pallas as pl
from jax.experimental.pallas import tpu as pltpu

EPS = 1e-5


def _round_up(x, m):
    return (x + m - 1) // m * m


# ---------------------------------------------------------------------------
# Pass 1: fused conv+gate matmul (bf16 MXU, f32 accumulate) + per-tile
#         masked channel sum / sum-of-squares for the global BN statistics.
# ---------------------------------------------------------------------------
def _matmul_stats_kernel(xp_ref, w_ref, y_ref, part_ref, *, tm, m_valid, need_mask):
    y = jnp.dot(xp_ref[...], w_ref[...], preferred_element_type=jnp.float32)
    y_ref[...] = y                                           # (tm, 2*Cpad) f32

    if need_mask:  # zero out rows that are pure M-padding before reducing
        row = pl.program_id(0) * tm + lax.broadcasted_iota(jnp.int32, (tm, 1), 0)
        y = jnp.where(row < m_valid, y, 0.0)

    s = jnp.sum(y, axis=0, keepdims=True)                    # (1, 2*Cpad)
    ssq = jnp.sum(y * y, axis=0, keepdims=True)              # (1, 2*Cpad)
    part_ref[...] = jnp.concatenate([s, ssq], axis=0)[None]  # (1, 2, 2*Cpad)


# ---------------------------------------------------------------------------
# Pass 2: per-element fused BN (y*scale + shift), sigmoid gate, product.
# ---------------------------------------------------------------------------
def _bn_gate_kernel(y_ref, ss_ref, out_ref, *, cpad):
    z = y_ref[...] * ss_ref[0:1, :] + ss_ref[1:2, :]         # (tm, 2*Cpad)
    x1 = z[:, :cpad]                                         # conv branch
    x2 = jax.nn.sigmoid(z[:, cpad:])                         # gate branch
    out_ref[...] = x1 * x2


def _im2col_nhwc(x_nhwc, k, stride, padding):
    """im2col. Returns (N*Ho*Wo, k*k*Cin) with patch ordering (kh, kw, cin)."""
    n, h, w, cin = x_nhwc.shape
    xp = jnp.pad(x_nhwc, ((0, 0), (padding, padding), (padding, padding), (0, 0)))
    ho = (h + 2 * padding - k) // stride + 1
    wo = (w + 2 * padding - k) // stride + 1
    cols = []
    for kh in range(k):
        for kw in range(k):
            sl = xp[:, kh:kh + stride * ho:stride, kw:kw + stride * wo:stride, :]
            cols.append(sl)
    patches = jnp.concatenate(cols, axis=-1)                 # (N,Ho,Wo,k*k*Cin)
    return patches.reshape(n * ho * wo, k * k * cin), (n, ho, wo)


def gated_block_bn(x_nchw, params, k, stride, padding, *, tm=256):
    """x_nchw: (N, Cin, H, W) float32.  Returns (N, Cout, Ho, Wo) float32."""
    wc, bc, wg, bg, gc, betac, gg, betag = params            # wc/wg: (KKC, Cout)
    del bc, bg  # conv bias cancels exactly under training-mode BatchNorm
    kkc, cout = wc.shape
    cpad = _round_up(cout, 128)                              # lane-dense Cout
    c2 = 2 * cpad

    # im2col in bf16 (halves the amplified HBM traffic of the patch matrix).
    x_nhwc = jnp.transpose(x_nchw, (0, 2, 3, 1)).astype(jnp.bfloat16)
    xp, (n, ho, wo) = _im2col_nhwc(x_nhwc, k, stride, padding)
    m = xp.shape[0]
    tm = min(tm, _round_up(m, 8))
    mpad = _round_up(m, tm)
    nmt = mpad // tm
    if mpad != m:
        xp = jnp.pad(xp, ((0, mpad - m), (0, 0)))

    # Single concatenated, zero-padded weight -> one lane-dense matmul.
    w = jnp.zeros((kkc, c2), jnp.float32)
    w = w.at[:, :cout].set(wc).at[:, cpad:cpad + cout].set(wg).astype(jnp.bfloat16)
    gamma = jnp.zeros((c2,), jnp.float32)
    gamma = gamma.at[:cout].set(gc.reshape(-1)).at[cpad:cpad + cout].set(gg.reshape(-1))
    beta = jnp.zeros((c2,), jnp.float32)
    beta = beta.at[:cout].set(betac.reshape(-1)).at[cpad:cpad + cout].set(betag.reshape(-1))

    # ---- pass 1: matmul + per-tile BN partials ------------------------------
    flops1 = 2 * mpad * kkc * c2
    bytes1 = xp.size * 2 + w.size * 2 + mpad * c2 * 4 + nmt * 2 * c2 * 4
    y, partial = pl.pallas_call(
        functools.partial(_matmul_stats_kernel, tm=tm, m_valid=m,
                          need_mask=(mpad != m)),
        grid=(nmt,),
        in_specs=[pl.BlockSpec((tm, kkc), lambda i: (i, 0)),
                  pl.BlockSpec((kkc, c2), lambda i: (0, 0))],
        out_specs=[pl.BlockSpec((tm, c2), lambda i: (i, 0)),
                   pl.BlockSpec((1, 2, c2), lambda i: (i, 0, 0))],
        out_shape=[jax.ShapeDtypeStruct((mpad, c2), jnp.float32),
                   jax.ShapeDtypeStruct((nmt, 2, c2), jnp.float32)],
        compiler_params=pltpu.CompilerParams(dimension_semantics=("parallel",)),
        cost_estimate=pl.CostEstimate(flops=flops1, transcendentals=0,
                                      bytes_accessed=bytes1),
    )(xp, w)

    # ---- global BN stats + per-channel scale/shift (tiny, plain JAX) --------
    sums = jnp.sum(partial, axis=0)                          # (2, c2)
    mean = sums[0] / m
    var = jnp.maximum(sums[1] / m - mean * mean, 0.0)        # biased variance
    scale = gamma * lax.rsqrt(var + EPS)
    shift = beta - mean * scale
    ss = jnp.stack([scale, shift], axis=0)                   # (2, c2) packed

    # ---- pass 2: normalize + sigmoid gate + product --------------------------
    flops2 = mpad * (3 * c2 + cpad)
    bytes2 = mpad * c2 * 4 + mpad * cpad * 4 + 2 * c2 * 4
    out_pad = pl.pallas_call(
        functools.partial(_bn_gate_kernel, cpad=cpad),
        grid=(nmt,),
        in_specs=[pl.BlockSpec((tm, c2), lambda i: (i, 0)),
                  pl.BlockSpec((2, c2), lambda i: (0, 0))],
        out_specs=pl.BlockSpec((tm, cpad), lambda i: (i, 0)),
        out_shape=jax.ShapeDtypeStruct((mpad, cpad), jnp.float32),
        compiler_params=pltpu.CompilerParams(dimension_semantics=("parallel",)),
        cost_estimate=pl.CostEstimate(flops=flops2, transcendentals=mpad * cpad,
                                      bytes_accessed=bytes2),
    )(y, ss)

    out_nhwc = out_pad[:m, :cout].reshape(n, ho, wo, cout)
    return jnp.transpose(out_nhwc, (0, 3, 1, 2))             # back to NCHW


def init_params(key, c_in, c_out, k):
    """Deterministic parameter init (shapes match the PyTorch module)."""
    k1, k2, k3, k4 = jax.random.split(key, 4)
    fan_in = c_in * k * k
    bound = 1.0 / jnp.sqrt(fan_in)
    # PyTorch conv weight is (Cout, Cin, K, K); im2col ordering is (kh, kw, cin)
    # -> flatten weight as (K*K*Cin, Cout).
    wc_t = jax.random.uniform(k1, (c_out, c_in, k, k), jnp.float32, -bound, bound)
    wg_t = jax.random.uniform(k2, (c_out, c_in, k, k), jnp.float32, -bound, bound)
    wc = jnp.transpose(wc_t, (2, 3, 1, 0)).reshape(k * k * c_in, c_out)
    wg = jnp.transpose(wg_t, (2, 3, 1, 0)).reshape(k * k * c_in, c_out)
    bc = jax.random.uniform(k3, (1, c_out), jnp.float32, -bound, bound)
    bg = jax.random.uniform(k4, (1, c_out), jnp.float32, -bound, bound)
    # BatchNorm affine params (PyTorch default init: gamma=1, beta=0)
    gc = jnp.ones((1, c_out), jnp.float32)
    betac = jnp.zeros((1, c_out), jnp.float32)
    gg = jnp.ones((1, c_out), jnp.float32)
    betag = jnp.zeros((1, c_out), jnp.float32)
    return (wc, bc, wg, bg, gc, betac, gg, betag), (wc_t, wg_t)


def reference(x_nchw, params_t, params, k, stride, padding):
    """Pure-JAX f32 reference (lax.conv) of the training-mode forward pass."""
    wc_t, wg_t = params_t
    _, bc, _, bg, gc, betac, gg, betag = params

    def conv(x, w, b):
        y = lax.conv_general_dilated(
            x, w, window_strides=(stride, stride),
            padding=[(padding, padding), (padding, padding)],
            dimension_numbers=("NCHW", "OIHW", "NCHW"))
        return y + b.reshape(1, -1, 1, 1)

    def bn(y, gamma, beta):
        mu = jnp.mean(y, axis=(0, 2, 3), keepdims=True)
        var = jnp.mean((y - mu) ** 2, axis=(0, 2, 3), keepdims=True)
        return (y - mu) * lax.rsqrt(var + EPS) * gamma.reshape(1, -1, 1, 1) \
            + beta.reshape(1, -1, 1, 1)

    x1 = bn(conv(x_nchw, wc_t, bc), gc, betac)
    x2 = jax.nn.sigmoid(bn(conv(x_nchw, wg_t, bg), gg, betag))
    return x1 * x2


if __name__ == "__main__":
    key = jax.random.PRNGKey(0)
    kx, kp = jax.random.split(key)

    # Small shapes: batch=2, c_in=4, c_out=8, spatial=16, 3x3 conv s=1 p=1.
    N, C_IN, H, W = 2, 4, 16, 16
    C_OUT, K, STRIDE, PAD = 8, 3, 1, 1

    x = jax.random.normal(kx, (N, C_IN, H, W), jnp.float32)
    params, params_t = init_params(kp, C_IN, C_OUT, K)

    out = gated_block_bn(x, params, K, STRIDE, PAD)
    out = jax.block_until_ready(out)

    ref = reference(x, params_t, params, K, STRIDE, PAD)
    assert out.shape == (N, C_OUT, H, W)
    # bf16 MXU inputs vs f32 reference -> slightly looser tolerance.
    assert jnp.allclose(out, ref, atol=5e-2, rtol=5e-2), \
        f"max err {jnp.max(jnp.abs(out - ref))}"

    print("KERNEL_OK")
</pallas_src>

<mosaic_0001>
module attributes {stable_mosaic.version = 11 : i64} {
  func.func @_matmul_stats_kernel(%arg0: i32, %arg1: memref<256x36xbf16, #tpu.memory_space<vmem>>, %arg2: memref<36x256xbf16, #tpu.memory_space<vmem>>, %arg3: memref<256x256xf32, #tpu.memory_space<vmem>>, %arg4: memref<1x2x256xf32, #tpu.memory_space<vmem>>) attributes {dimension_semantics = [#tpu.dimension_semantics<parallel>], iteration_bounds = array<i64: 2>, scalar_prefetch = 0 : i64, scratch_operands = 0 : i64, tpu.core_type = #tpu.core_type<tc>, window_params = [{transform_indices = @transform_0, window_bounds = array<i64: 256, 36>}, {pipeline_mode = #tpu.pipeline_mode<synchronous>, transform_indices = @transform_1, window_bounds = array<i64: 36, 256>}, {transform_indices = @transform_2, window_bounds = array<i64: 256, 256>}, {transform_indices = @transform_3, window_bounds = array<i64: 1, 2, 256>}]} {
    %c0 = arith.constant 0 : index
    %c0_0 = arith.constant 0 : index
    %0 = vector.load %arg1[%c0, %c0_0] : memref<256x36xbf16, #tpu.memory_space<vmem>>, vector<256x36xbf16>
    %c0_1 = arith.constant 0 : index
    %c0_2 = arith.constant 0 : index
    %1 = vector.load %arg2[%c0_1, %c0_2] : memref<36x256xbf16, #tpu.memory_space<vmem>>, vector<36x256xbf16>
    %cst = arith.constant dense<0.000000e+00> : vector<256x256xf32>
    %2 = tpu.matmul %0, %1, %cst {dimension_numbers = #tpu.dot_dimension_numbers<[1], [0], [0], [1], [0, 0, 1, 1], [], []>} : vector<256x36xbf16>, vector<36x256xbf16>, vector<256x256xf32> -> vector<256x256xf32>
    %c0_3 = arith.constant 0 : index
    %c0_4 = arith.constant 0 : index
    %3 = vector.load %arg3[%c0_3, %c0_4] : memref<256x256xf32, #tpu.memory_space<vmem>>, vector<256x256xf32>
    tpu.vector_store %arg3[%c0_3, %c0_4], %2 {strides = array<i32>} : memref<256x256xf32, #tpu.memory_space<vmem>>, vector<256x256xf32>,
    %cst_5 = arith.constant dense<0.000000e+00> : vector<256xf32>
    %4 = vector.multi_reduction <add>, %2, %cst_5 [0] : vector<256x256xf32> to vector<256xf32>
    %5 = vector.shape_cast %4 : vector<256xf32> to vector<1x256xf32>
    %6 = arith.mulf %2, %2 : vector<256x256xf32>
    %cst_6 = arith.constant dense<0.000000e+00> : vector<256xf32>
    %7 = vector.multi_reduction <add>, %6, %cst_6 [0] : vector<256x256xf32> to vector<256xf32>
    %8 = vector.shape_cast %7 : vector<256xf32> to vector<1x256xf32>
    %9 = tpu.concatenate %5, %8 in 0 : vector<1x256xf32>, vector<1x256xf32> -> vector<2x256xf32>
    %10 = vector.shape_cast %9 : vector<2x256xf32> to vector<1x2x256xf32>
    %c0_7 = arith.constant 0 : index
    %c0_8 = arith.constant 0 : index
    %c0_9 = arith.constant 0 : index
    %11 = vector.load %arg4[%c0_7, %c0_8, %c0_9] : memref<1x2x256xf32, #tpu.memory_space<vmem>>, vector<1x2x256xf32>
    tpu.vector_store %arg4[%c0_7, %c0_8, %c0_9], %10 {strides = array<i32>} : memref<1x2x256xf32, #tpu.memory_space<vmem>>, vector<1x2x256xf32>,
    return
  }
  func.func @transform_0(%arg0: i32) -> (i32, i32) {
    %c0_i32 = arith.constant 0 : i32
    %c0_i32_0 = arith.constant 0 : i32
    return %arg0, %c0_i32 : i32, i32
  }
  func.func @transform_1(%arg0: i32) -> (i32, i32) {
    %c0_i32 = arith.constant 0 : i32
    %c0_i32_0 = arith.constant 0 : i32
    %c0_i32_1 = arith.constant 0 : i32
    return %c0_i32, %c0_i32_0 : i32, i32
  }
  func.func @transform_2(%arg0: i32) -> (i32, i32) {
    %c0_i32 = arith.constant 0 : i32
    %c0_i32_0 = arith.constant 0 : i32
    return %arg0, %c0_i32 : i32, i32
  }
  func.func @transform_3(%arg0: i32) -> (i32, i32, i32) {
    %c0_i32 = arith.constant 0 : i32
    %c0_i32_0 = arith.constant 0 : i32
    %c0_i32_1 = arith.constant 0 : i32
    return %arg0, %c0_i32, %c0_i32_0 : i32, i32, i32
  }
}

</mosaic_0001>

<bundles_post_ra>
// kernel: tpu_custom_call.1
= control target key start
LH: loop header
LB: loop body
LE: loop exit
PB: predicated region body
PF: predicated region fallthrough
CT: control target
= control target key end

     0   :  { %9 = vsyncpa [#allocation3], 0  ;;  %s1712_s0 = inlined_call_operand.vmem [shape: bf16[512,36], index: 0, kind: input, shape index: {}]   ;;  %s1713_s1 = inlined_call_operand.vmem [shape: bf16[36,256], index: 1, kind: input, shape index: {}]   ;;  %s1714_s2 = inlined_call_operand.hbm [shape: f32[512,256], index: 2, kind: output, shape index: {0}]   ;;  %s1715_s3 = inlined_call_operand.hbm [shape: f32[2,2,256], index: 3, kind: output, shape index: {1}]  }
   0x1   :  { %11 = vsyncpa [#allocation3 + $0x1], 0 }
   0x2   :  { %12 = vsyncpa [#allocation5], 0 }
   0x3   :  { %14 = vsyncpa [#allocation5 + $0x1], 0  ;;  %s1252_s12 = smov 0   ;;  %s1254_s13 = smov 0  }
   0x4   :  { %s1256_s14 = smov 0   ;;  %s1258_s15 = smov 0  }
   0x5 LB: > { %s1273_s16 = sadd.s32 4294967295, %s1225_s15   ;;  %s994_s17 = sadd.s32 4294967294, %s1225_s15   ;;  %s1225_s15 = sphi %s1258_s15, %s1721_s15   ;;  %s1221_s14 = sphi %s1256_s14, %s1720_s14   ;;  %s1217_s13 = sphi %s1254_s13, %s1719_s13   ;;  %s1213_s12 = sphi %s1252_s12, %s1718_s12  }
   0x6   : > { %s1277_s18 = sadd.s32 1, %s1225_s15   ;;  %s74_s19 = sadd.s32 1, %s1221_s14 }
   0x7   : > { %s71_s20 = ssub.s32 %s1225_s15, %s1277_s18  ;;  %p84_p0 = scmp.ne.s32.totalorder %s1221_s14, %s1217_s13 }
   0x8   : > { %p72_p1 = scmp.eq.s32.totalorder %s71_s20, 0  ;;  %p85_p2 = scmp.eq.s32.totalorder %s1273_s16, 1 }
   0x9   : > { %p90_p3 = scmp.ne.s32.totalorder %s1217_s13, %s1213_s12  ;;  %p91_p4 = scmp.eq.s32.totalorder %s994_s17, 1 }
   0xa   : > { %s1288_s21 = scalar_select %p72_p1, %s1221_s14, %s74_s19  }
   0xb   : > { %p1290_p5 = por %p85_p2, %p84_p0  ;;  %p1294_p6 = por %p91_p4, %p90_p3 }
   0xc   : > { %p997_p7 = scmp.ge.s32.totalorder %s1225_s15, 1  ;;  %p147_p8 = scmp.lt.s32.totalorder %s1225_s15, 3 }
   0xe   : > { %p148_p9 = pnand %p997_p7, %p147_p8 }
   0xf   : > { %v1107_v0 = vld [vmem:[%s1713_s1 + $0x4] ss:$8 sps:$4 sm:$0xff] (!%p148_p9)   ;;  %v1109_v1 = vld [vmem:[%s1713_s1] ss:$8 sps:$4 sm:$0xff] (!%p148_p9)   ;;  %v1227_v2 = vmov (!%p148_p9), 0   ;;  %s1000_s28 = sshll.u32 (!%p148_p9), %s1273_s16, 5 }
  0x10   : > { %151 = sbr.rel (%p148_p9) target bundleno = 377 (0x179), region = 28  ;;  %414 = vmatprep.mubr.bf16.mxu0 (!%p148_p9), %v1227_v2  ;;  %494 = vmatprep.mubr.bf16.mxu1 (!%p148_p9), %v1227_v2  ;;  %v1110_v3 = vld [vmem:[%s1713_s1 + $0x14] ss:$8 sps:$4 sm:$0xff] (!%p148_p9)   ;;  %v220_v4 = vld [vmem:[%s1713_s1 + $0x20] sm:$0x33] (!%p148_p9)  ;;  %p177_p10 = scmp.lt.s32.totalorder (!%p148_p9), %s1000_s28, 63 }
  0x11   : > { %382 = vmatprep.subr.bf16.mxu0 (!%p148_p9), %v1107_v0  ;;  %1054 = vmatprep.subr.bf16.mxu1 (!%p148_p9), %v1107_v0  ;;  %v1112_v5 = vld [vmem:[%s1713_s1 + $0x10] ss:$8 sps:$4 sm:$0xff] (!%p148_p9)   ;;  %v1023_v6 = vcombine.high (!%p148_p9), %v220_v4, %v220_v4  ;;  %v1022_v7 = vcombine.low (!%p148_p9), %v220_v4, %v220_v4  ;;  %vm375_vm0 = vcmask (!%p148_p9), 1041408   ;;  %vm326_vm1 = vcmask (!%p148_p9), 293888   ;;  %s1370_s17 = sand.u32 (!%p148_p9), 1, %s1217_s13   ;;  %s1052_s24 = sshll.u32 (!%p148_p9), %s1273_s16, 13 }
  0x12   : > { %383 = vmatpush1.bf16.msra.mxu0 (!%p148_p9), %v1109_v1  ;;  %1057 = vmatpush1.bf16.msra.mxu1 (!%p148_p9), %v1109_v1  ;;  %s998_s19 = sshll.u32 (!%p148_p9), %s1370_s17, 9  ;;  %s867_s29 = scalar_lea.sflag (!%p148_p9), [#allocation3], %s1370_s17 }
  0x13   : > { %384 = vmatprep.subr.bf16.mxu0 (!%p148_p9), %v1110_v3  ;;  %1055 = vmatprep.subr.bf16.mxu1 (!%p148_p9), %v1110_v3  ;;  %v377_v8 = vsel (!%p148_p9), %vm375_vm0, %v1022_v7, 0  ;;  %s1373_s20 = scalar_lea.vmem (!%p148_p9), [#allocation2], %s998_s19  ;;  %s1228_s4 = smov (!%p148_p9), [#allocation2]  }
  0x14   : > { %s886_s25 = sshll.u32 (!%p148_p9), %s1373_s20, 4  ;;  %s1135_s5 = sshll.u32 (!%p148_p9), %s1228_s4, 4  ;;  %s1530_s25 = int_to_ptr.vmem [resolvable:$true] %s886_s25  ;;  %s1136_s5 = int_to_ptr.vmem [resolvable:$false] %s1135_s5 }
  0x15   : > { %s1131_s30 = scalar_lea.vmem (!%p148_p9), %s1530_s25, 8192  ;;  %s1137_s6 = scalar_lea.vmem (!%p148_p9), %s1136_s5, 16384 }
  0x16   : > { %385 = vmatpush1.bf16.msra.mxu0 (!%p148_p9), %v1112_v5  ;;  %1058 = vmatpush1.bf16.msra.mxu1 (!%p148_p9), %v1112_v5  ;;  %p1132_p11 = scmp.ne.s32.totalorder (!%p148_p9), %s1530_s25, %s1131_s30  ;;  %p1138_p0 = scmp.lt.s32.totalorder (!%p148_p9), %s1530_s25, %s1136_s5 }
  0x17   : > { %s1723_s28 = smov (!%p177_p10, %s1000_s28), 63  ;;  %1024 = vmatprep.subr.msk.bf16.mxu0 %vm375_vm0, %v1023_v6  ;;  %1056 = vmatprep.subr.msk.bf16.mxu1 %vm375_vm0, %v1023_v6  ;;  %p1139_p1 = scmp.lt.s32.totalorder %s1137_s6, %s1131_s30 }
  0x18   : > { %s1001_s8 = sshll.u32 %s1723_s28, 2  ;;  %s1528_s28 = scalar_lea.hbm %s1714_s2, %s1052_s24 }
  0x19   : > { %s1321_s11 = scalar_lea.vmem %s1712_s0, %s1001_s8  ;;  %p1133_p12 = pnand %p1132_p11, %p1290_p5 }
  0x1a   : > { %v1115_v9 = vld [vmem:[%s1321_s11] sm:$0xff]   ;;  %387 = vmatpush1.bf16.msra.mxu0 %v377_v8  ;;  %1059 = vmatpush1.bf16.msra.mxu1 %v377_v8  ;;  %v1116_v11 = vld [vmem:[%s1321_s11 + $0x8] sm:$0xff]   ;;  %v1117_v13 = vld [vmem:[%s1321_s11 + $0x10] sm:$0xff]   ;;  %p1140_p2 = por %p1139_p1, %p1138_p0 }
  0x1b   : > { %v1119_v10 = vld [vmem:[%s1321_s11 + $0x40] sm:$0xff]   ;;  %v1121_v12 = vld [vmem:[%s1321_s11 + $0x48] sm:$0xff]   ;;  %v1123_v14 = vld [vmem:[%s1321_s11 + $0x50] sm:$0xff]   ;;  %p1134_p13 = pneg %p1133_p12 }
  0x1c   : > { %v1118_v15 = vld [vmem:[%s1321_s11 + $0x18] sm:$0xff]   ;;  %v1120_v17 = vld [vmem:[%s1321_s11 + $0x20] sm:$0xff]   ;;  %v1122_v19 = vld [vmem:[%s1321_s11 + $0x28] sm:$0xff]  }
  0x1d   : > { %1025 = vmatmul.mubr.msk.bf16.vlgmr.msra.gmra.mrb[0].mxu0 %vm326_vm1, %v1115_v9  ;;  %1033 = vmatmul.mubr.msk.bf16.vlgmr.msra.gmra.mrb[0].mxu1 %vm326_vm1, %v1119_v10  ;;  %v1125_v16 = vld [vmem:[%s1321_s11 + $0x58] sm:$0xff]   ;;  %v1127_v18 = vld [vmem:[%s1321_s11 + $0x60] sm:$0xff]   ;;  %v1128_v20 = vld [vmem:[%s1321_s11 + $0x68] sm:$0xff]   ;;  %p1141_p3 = pnand %p1140_p2, %p1134_p13 }
  0x1e   : > { %424 = vmatprep.mubr.bf16.mxu0 %v1227_v2  ;;  %504 = vmatprep.mubr.bf16.mxu1 %v1227_v2  ;;  %v1124_v21 = vld [vmem:[%s1321_s11 + $0x30] sm:$0xff]   ;;  %v1126_v23 = vld [vmem:[%s1321_s11 + $0x38] sm:$0xff]  }
  0x1f   : > { %v1129_v22 = vld [vmem:[%s1321_s11 + $0x70] sm:$0xff]   ;;  %v1130_v24 = vld [vmem:[%s1321_s11 + $0x78] sm:$0xff]  }
  0x25   : > { %1026 = vmatmul.mubr.msk.bf16.gmra.mrb[4].mxu0 %vm326_vm1, %v1116_v11  ;;  %1034 = vmatmul.mubr.msk.bf16.gmra.mrb[4].mxu1 %vm326_vm1, %v1121_v12 }
  0x26   : > { %434 = vmatprep.mubr.bf16.mxu0 %v1227_v2  ;;  %514 = vmatprep.mubr.bf16.mxu1 %v1227_v2 }
  0x2d   : > { %1027 = vmatmul.mubr.msk.bf16.gmra.mrb[8].mxu0 %vm326_vm1, %v1117_v13  ;;  %1035 = vmatmul.mubr.msk.bf16.gmra.mrb[8].mxu1 %vm326_vm1, %v1123_v14 }
  0x2e   : > { %444 = vmatprep.mubr.bf16.mxu0 %v1227_v2  ;;  %524 = vmatprep.mubr.bf16.mxu1 %v1227_v2 }
  0x35   : > { %1028 = vmatmul.mubr.msk.bf16.gmra.mrb[12].mxu0 %vm326_vm1, %v1118_v15  ;;  %1036 = vmatmul.mubr.msk.bf16.gmra.mrb[12].mxu1 %vm326_vm1, %v1125_v16 }
  0x36   : > { %454 = vmatprep.mubr.bf16.mxu0 %v1227_v2  ;;  %534 = vmatprep.mubr.bf16.mxu1 %v1227_v2 }
  0x3d   : > { %1029 = vmatmul.mubr.msk.bf16.gmra.mrb[16].mxu0 %vm326_vm1, %v1120_v17  ;;  %1037 = vmatmul.mubr.msk.bf16.gmra.mrb[16].mxu1 %vm326_vm1, %v1127_v18 }
  0x3e   : > { %464 = vmatprep.mubr.bf16.mxu0 %v1227_v2  ;;  %544 = vmatprep.mubr.bf16.mxu1 %v1227_v2 }
  0x45   : > { %1030 = vmatmul.mubr.msk.bf16.gmra.mrb[20].mxu0 %vm326_vm1, %v1122_v19  ;;  %1038 = vmatmul.mubr.msk.bf16.gmra.mrb[20].mxu1 %vm326_vm1, %v1128_v20 }
  0x46   : > { %474 = vmatprep.mubr.bf16.mxu0 %v1227_v2  ;;  %554 = vmatprep.mubr.bf16.mxu1 %v1227_v2 }
  0x4d   : > { %1031 = vmatmul.mubr.msk.bf16.gmra.mrb[24].mxu0 %vm326_vm1, %v1124_v21  ;;  %1039 = vmatmul.mubr.msk.bf16.gmra.mrb[24].mxu1 %vm326_vm1, %v1129_v22 }
  0x4e   : > { %484 = vmatprep.mubr.bf16.mxu0 %v1227_v2  ;;  %564 = vmatprep.mubr.bf16.mxu1 %v1227_v2 }
  0x55   : > { %1032 = vmatmul.mubr.msk.bf16.gmra.mrb[28].mxu0 %vm326_vm1, %v1126_v23  ;;  %1040 = vmatmul.mubr.msk.bf16.gmra.mrb[28].mxu1 %vm326_vm1, %v1130_v24 }
  0xf0   : > { %v416_v25 = vpop.f32.mrb[0].mxu0  ;;  %v1376_v27 = vpop.f32.mrb[0].mxu1 }
  0xf1   : > { %575 = vst [vmem:[%s1373_s20] sm:$0xff] %v416_v25  ;;  %v418_v26 = vpop.f32.mrb[1].mxu0  ;;  %607 = vst [vmem:[%s1373_s20 + $0x100] sm:$0xff] %v1376_v27  ;;  %v1381_v29 = vpop.f32.mrb[1].mxu1  ;;  %v713_v30 = vmul.f32 %v416_v25, %v416_v25 }
  0xf2   : > { %576 = vst [vmem:[%s1373_s20 + $0x8] sm:$0xff] %v418_v26  ;;  %v420_v28 = vpop.f32.mrb[2].mxu0  ;;  %608 = vst [vmem:[%s1373_s20 + $0x108] sm:$0xff] %v1381_v29  ;;  %v1386_v34 = vpop.f32.mrb[2].mxu1  ;;  %v714_v35 = vmul.f32 %v418_v26, %v418_v26 }
  0xf3   : > { %577 = vst [vmem:[%s1373_s20 + $0x10] sm:$0xff] %v420_v28  ;;  %v639_v31 = vadd.f32 %v420_v28, %v416_v25  ;;  %v715_v32 = vmul.f32 %v420_v28, %v420_v28  ;;  %v422_v33 = vpop.f32.mrb[3].mxu0  ;;  %609 = vst [vmem:[%s1373_s20 + $0x110] sm:$0xff] %v1386_v34  ;;  %v1391_v38 = vpop.f32.mrb[3].mxu1 }
  0xf4   : > { %578 = vst [vmem:[%s1373_s20 + $0x18] sm:$0xff] %v422_v33  ;;  %v676_v36 = vadd.f32 %v422_v33, %v418_v26  ;;  %v716_v37 = vmul.f32 %v422_v33, %v422_v33  ;;  %610 = vst [vmem:[%s1373_s20 + $0x118] sm:$0xff] %v1391_v38 }
  0xf5   : > { %v777_v39 = vadd.f32 %v715_v32, %v713_v30 }
  0xf6   : > { %v814_v40 = vadd.f32 %v716_v37, %v714_v35 }
  0xf8   : > { %v426_v41 = vpop.f32.mrb[4].mxu0  ;;  %v1396_v45 = vpop.f32.mrb[4].mxu1 }
  0xf9   : > { %579 = vst [vmem:[%s1373_s20 + $0x20] sm:$0xff] %v426_v41  ;;  %v640_v42 = vadd.f32 %v639_v31, %v426_v41  ;;  %v717_v43 = vmul.f32 %v426_v41, %v426_v41  ;;  %v428_v44 = vpop.f32.mrb[5].mxu0  ;;  %611 = vst [vmem:[%s1373_s20 + $0x120] sm:$0xff] %v1396_v45  ;;  %v1401_v49 = vpop.f32.mrb[5].mxu1 }
  0xfa   : > { %580 = vst [vmem:[%s1373_s20 + $0x28] sm:$0xff] %v428_v44  ;;  %v677_v46 = vadd.f32 %v676_v36, %v428_v44  ;;  %v718_v47 = vmul.f32 %v428_v44, %v428_v44  ;;  %v430_v48 = vpop.f32.mrb[6].mxu0  ;;  %612 = vst [vmem:[%s1373_s20 + $0x128] sm:$0xff] %v1401_v49  ;;  %v1406_v54 = vpop.f32.mrb[6].mxu1 }
  0xfb   : > { %v778_v50 = vadd.f32 %v777_v39, %v717_v43  ;;  %581 = vst [vmem:[%s1373_s20 + $0x30] sm:$0xff] %v430_v48  ;;  %v641_v51 = vadd.f32 %v640_v42, %v430_v48  ;;  %v719_v52 = vmul.f32 %v430_v48, %v430_v48  ;;  %v432_v53 = vpop.f32.mrb[7].mxu0  ;;  %613 = vst [vmem:[%s1373_s20 + $0x130] sm:$0xff] %v1406_v54  ;;  %v1411_v58 = vpop.f32.mrb[7].mxu1 }
  0xfc   : > { %v815_v55 = vadd.f32 %v814_v40, %v718_v47  ;;  %582 = vst [vmem:[%s1373_s20 + $0x38] sm:$0xff] %v432_v53  ;;  %v678_v56 = vadd.f32 %v677_v46, %v432_v53  ;;  %v720_v57 = vmul.f32 %v432_v53, %v432_v53  ;;  %614 = vst [vmem:[%s1373_s20 + $0x138] sm:$0xff] %v1411_v58 }
  0xfd   : > { %v779_v59 = vadd.f32 %v778_v50, %v719_v52 }
  0xfe   : > { %v816_v60 = vadd.f32 %v815_v55, %v720_v57 }
 0x100   : > { %v436_v61 = vpop.f32.mrb[8].mxu0  ;;  %v1416_v1 = vpop.f32.mrb[8].mxu1 }
 0x101   : > { %583 = vst [vmem:[%s1373_s20 + $0x40] sm:$0xff] %v436_v61  ;;  %v642_v62 = vadd.f32 %v641_v51, %v436_v61  ;;  %v721_v63 = vmul.f32 %v436_v61, %v436_v61  ;;  %v438_v0 = vpop.f32.mrb[9].mxu0  ;;  %615 = vst [vmem:[%s1373_s20 + $0x140] sm:$0xff] %v1416_v1  ;;  %v1421_v5 = vpop.f32.mrb[9].mxu1 }
 0x102   : > { %584 = vst [vmem:[%s1373_s20 + $0x48] sm:$0xff] %v438_v0  ;;  %v679_v2 = vadd.f32 %v678_v56, %v438_v0  ;;  %v722_v3 = vmul.f32 %v438_v0, %v438_v0  ;;  %v440_v4 = vpop.f32.mrb[10].mxu0  ;;  %616 = vst [vmem:[%s1373_s20 + $0x148] sm:$0xff] %v1421_v5  ;;  %v1426_v10 = vpop.f32.mrb[10].mxu1 }
 0x103   : > { %v780_v6 = vadd.f32 %v779_v59, %v721_v63  ;;  %585 = vst [vmem:[%s1373_s20 + $0x50] sm:$0xff] %v440_v4  ;;  %v643_v7 = vadd.f32 %v642_v62, %v440_v4  ;;  %v723_v8 = vmul.f32 %v440_v4, %v440_v4  ;;  %v442_v9 = vpop.f32.mrb[11].mxu0  ;;  %617 = vst [vmem:[%s1373_s20 + $0x150] sm:$0xff] %v1426_v10  ;;  %v1431_v14 = vpop.f32.mrb[11].mxu1 }
 0x104   : > { %v817_v11 = vadd.f32 %v816_v60, %v722_v3  ;;  %586 = vst [vmem:[%s1373_s20 + $0x58] sm:$0xff] %v442_v9  ;;  %v680_v12 = vadd.f32 %v679_v2, %v442_v9  ;;  %v724_v13 = vmul.f32 %v442_v9, %v442_v9  ;;  %618 = vst [vmem:[%s1373_s20 + $0x158] sm:$0xff] %v1431_v14 }
 0x105   : > { %v781_v15 = vadd.f32 %v780_v6, %v723_v8 }
 0x106   : > { %v818_v16 = vadd.f32 %v817_v11, %v724_v13 }
 0x108   : > { %v446_v17 = vpop.f32.mrb[12].mxu0  ;;  %v1436_v21 = vpop.f32.mrb[12].mxu1 }
 0x109   : > { %587 = vst [vmem:[%s1373_s20 + $0x60] sm:$0xff] %v446_v17  ;;  %v644_v18 = vadd.f32 %v643_v7, %v446_v17  ;;  %v725_v19 = vmul.f32 %v446_v17, %v446_v17  ;;  %v448_v20 = vpop.f32.mrb[13].mxu0  ;;  %619 = vst [vmem:[%s1373_s20 + $0x160] sm:$0xff] %v1436_v21  ;;  %v1441_v25 = vpop.f32.mrb[13].mxu1 }
 0x10a   : > { %588 = vst [vmem:[%s1373_s20 + $0x68] sm:$0xff] %v448_v20  ;;  %v681_v22 = vadd.f32 %v680_v12, %v448_v20  ;;  %v726_v23 = vmul.f32 %v448_v20, %v448_v20  ;;  %v450_v24 = vpop.f32.mrb[14].mxu0  ;;  %620 = vst [vmem:[%s1373_s20 + $0x168] sm:$0xff] %v1441_v25  ;;  %v1446_v32 = vpop.f32.mrb[14].mxu1 }
 0x10b   : > { %v782_v26 = vadd.f32 %v781_v15, %v725_v19  ;;  %589 = vst [vmem:[%s1373_s20 + $0x70] sm:$0xff] %v450_v24  ;;  %v645_v28 = vadd.f32 %v644_v18, %v450_v24  ;;  %v727_v30 = vmul.f32 %v450_v24, %v450_v24  ;;  %v452_v31 = vpop.f32.mrb[15].mxu0  ;;  %621 = vst [vmem:[%s1373_s20 + $0x170] sm:$0xff] %v1446_v32  ;;  %v1451_v37 = vpop.f32.mrb[15].mxu1 }
 0x10c   : > { %v819_v33 = vadd.f32 %v818_v16, %v726_v23  ;;  %590 = vst [vmem:[%s1373_s20 + $0x78] sm:$0xff] %v452_v31  ;;  %v682_v35 = vadd.f32 %v681_v22, %v452_v31  ;;  %v728_v36 = vmul.f32 %v452_v31, %v452_v31  ;;  %622 = vst [vmem:[%s1373_s20 + $0x178] sm:$0xff] %v1451_v37 }
 0x10d   : > { %v783_v39 = vadd.f32 %v782_v26, %v727_v30 }
 0x10e   : > { %v820_v40 = vadd.f32 %v819_v33, %v728_v36 }
 0x110   : > { %v456_v41 = vpop.f32.mrb[16].mxu0  ;;  %v1456_v46 = vpop.f32.mrb[16].mxu1 }
 0x111   : > { %591 = vst [vmem:[%s1373_s20 + $0x80] sm:$0xff] %v456_v41  ;;  %v646_v42 = vadd.f32 %v645_v28, %v456_v41  ;;  %v729_v43 = vmul.f32 %v456_v41, %v456_v41  ;;  %v458_v44 = vpop.f32.mrb[17].mxu0  ;;  %623 = vst [vmem:[%s1373_s20 + $0x180] sm:$0xff] %v1456_v46  ;;  %v1461_v51 = vpop.f32.mrb[17].mxu1 }
 0x112   : > { %592 = vst [vmem:[%s1373_s20 + $0x88] sm:$0xff] %v458_v44  ;;  %v683_v47 = vadd.f32 %v682_v35, %v458_v44  ;;  %v730_v48 = vmul.f32 %v458_v44, %v458_v44  ;;  %v460_v50 = vpop.f32.mrb[18].mxu0  ;;  %624 = vst [vmem:[%s1373_s20 + $0x188] sm:$0xff] %v1461_v51  ;;  %v1466_v57 = vpop.f32.mrb[18].mxu1 }
 0x113   : > { %v784_v52 = vadd.f32 %v783_v39, %v729_v43  ;;  %593 = vst [vmem:[%s1373_s20 + $0x90] sm:$0xff] %v460_v50  ;;  %v647_v53 = vadd.f32 %v646_v42, %v460_v50  ;;  %v731_v55 = vmul.f32 %v460_v50, %v460_v50  ;;  %v462_v56 = vpop.f32.mrb[19].mxu0  ;;  %625 = vst [vmem:[%s1373_s20 + $0x190] sm:$0xff] %v1466_v57  ;;  %v1471_v62 = vpop.f32.mrb[19].mxu1 }
 0x114   : > { %v821_v59 = vadd.f32 %v820_v40, %v730_v48  ;;  %594 = vst [vmem:[%s1373_s20 + $0x98] sm:$0xff] %v462_v56  ;;  %v684_v60 = vadd.f32 %v683_v47, %v462_v56  ;;  %v732_v61 = vmul.f32 %v462_v56, %v462_v56  ;;  %626 = vst [vmem:[%s1373_s20 + $0x198] sm:$0xff] %v1471_v62 }
 0x115   : > { %v785_v63 = vadd.f32 %v784_v52, %v731_v55 }
 0x116   : > { %v822_v0 = vadd.f32 %v821_v59, %v732_v61 }
 0x118   : > { %v466_v2 = vpop.f32.mrb[20].mxu0  ;;  %v1476_v7 = vpop.f32.mrb[20].mxu1 }
 0x119   : > { %595 = vst [vmem:[%s1373_s20 + $0xa0] sm:$0xff] %v466_v2  ;;  %v648_v3 = vadd.f32 %v647_v53, %v466_v2  ;;  %v733_v4 = vmul.f32 %v466_v2, %v466_v2  ;;  %v468_v6 = vpop.f32.mrb[21].mxu0  ;;  %627 = vst [vmem:[%s1373_s20 + $0x1a0] sm:$0xff] %v1476_v7  ;;  %v1481_v12 = vpop.f32.mrb[21].mxu1 }
 0x11a   : > { %596 = vst [vmem:[%s1373_s20 + $0xa8] sm:$0xff] %v468_v6  ;;  %v685_v8 = vadd.f32 %v684_v60, %v468_v6  ;;  %v734_v9 = vmul.f32 %v468_v6, %v468_v6  ;;  %v470_v11 = vpop.f32.mrb[22].mxu0  ;;  %628 = vst [vmem:[%s1373_s20 + $0x1a8] sm:$0xff] %v1481_v12  ;;  %v1486_v18 = vpop.f32.mrb[22].mxu1 }
 0x11b   : > { %v786_v13 = vadd.f32 %v785_v63, %v733_v4  ;;  %597 = vst [vmem:[%s1373_s20 + $0xb0] sm:$0xff] %v470_v11  ;;  %v649_v15 = vadd.f32 %v648_v3, %v470_v11  ;;  %v735_v16 = vmul.f32 %v470_v11, %v470_v11  ;;  %v472_v17 = vpop.f32.mrb[23].mxu0  ;;  %629 = vst [vmem:[%s1373_s20 + $0x1b0] sm:$0xff] %v1486_v18  ;;  %v1491_v23 = vpop.f32.mrb[23].mxu1 }
 0x11c   : > { %v823_v19 = vadd.f32 %v822_v0, %v734_v9  ;;  %598 = vst [vmem:[%s1373_s20 + $0xb8] sm:$0xff] %v472_v17  ;;  %v686_v20 = vadd.f32 %v685_v8, %v472_v17  ;;  %v736_v22 = vmul.f32 %v472_v17, %v472_v17  ;;  %630 = vst [vmem:[%s1373_s20 + $0x1b8] sm:$0xff] %v1491_v23 }
 0x11d   : > { %v787_v24 = vadd.f32 %v786_v13, %v735_v16 }
 0x11e   : > { %v824_v26 = vadd.f32 %v823_v19, %v736_v22 }
 0x120   : > { %v476_v28 = vpop.f32.mrb[24].mxu0  ;;  %v1496_v35 = vpop.f32.mrb[24].mxu1 }
 0x121   : > { %599 = vst [vmem:[%s1373_s20 + $0xc0] sm:$0xff] %v476_v28  ;;  %v650_v30 = vadd.f32 %v649_v15, %v476_v28  ;;  %v737_v31 = vmul.f32 %v476_v28, %v476_v28  ;;  %v478_v33 = vpop.f32.mrb[25].mxu0  ;;  %631 = vst [vmem:[%s1373_s20 + $0x1c0] sm:$0xff] %v1496_v35  ;;  %v1501_v41 = vpop.f32.mrb[25].mxu1 }
 0x122   : > { %600 = vst [vmem:[%s1373_s20 + $0xc8] sm:$0xff] %v478_v33  ;;  %v687_v36 = vadd.f32 %v686_v20, %v478_v33  ;;  %v738_v39 = vmul.f32 %v478_v33, %v478_v33  ;;  %v480_v40 = vpop.f32.mrb[26].mxu0  ;;  %632 = vst [vmem:[%s1373_s20 + $0x1c8] sm:$0xff] %v1501_v41  ;;  %v1506_v48 = vpop.f32.mrb[26].mxu1 }
 0x123   : > { %v788_v42 = vadd.f32 %v787_v24, %v737_v31  ;;  %601 = vst [vmem:[%s1373_s20 + $0xd0] sm:$0xff] %v480_v40  ;;  %v651_v43 = vadd.f32 %v650_v30, %v480_v40  ;;  %v739_v44 = vmul.f32 %v480_v40, %v480_v40  ;;  %v482_v47 = vpop.f32.mrb[27].mxu0  ;;  %633 = vst [vmem:[%s1373_s20 + $0x1d0] sm:$0xff] %v1506_v48  ;;  %v1511_v55 = vpop.f32.mrb[27].mxu1 }
 0x124   : > { %v825_v50 = vadd.f32 %v824_v26, %v738_v39  ;;  %602 = vst [vmem:[%s1373_s20 + $0xd8] sm:$0xff] %v482_v47  ;;  %v688_v52 = vadd.f32 %v687_v36, %v482_v47  ;;  %v740_v53 = vmul.f32 %v482_v47, %v482_v47  ;;  %634 = vst [vmem:[%s1373_s20 + $0x1d8] sm:$0xff] %v1511_v55 }
 0x125   : > { %v789_v56 = vadd.f32 %v788_v42, %v739_v44  ;;  %v745_v24 = vmul.f32 %v1376_v27, %v1376_v27  ;;  %v746_v30 = vmul.f32 %v1381_v29, %v1381_v29 }
 0x126   : > { %v826_v59 = vadd.f32 %v825_v50, %v740_v53 }
 0x128   : > { %v486_v60 = vpop.f32.mrb[28].mxu0  ;;  %v1518_v2 = vpop.f32.mrb[28].mxu1 }
 0x129   : > { %603 = vst [vmem:[%s1373_s20 + $0xe0] sm:$0xff] %v486_v60  ;;  %v652_v61 = vadd.f32 %v651_v43, %v486_v60  ;;  %v741_v63 = vmul.f32 %v486_v60, %v486_v60  ;;  %v488_v0 = vpop.f32.mrb[29].mxu0  ;;  %635 = vst [vmem:[%s1373_s20 + $0x1e0] sm:$0xff] %v1518_v2  ;;  %v1523_v8 = vpop.f32.mrb[29].mxu1 }
 0x12a   : > { %604 = vst [vmem:[%s1373_s20 + $0xe8] sm:$0xff] %v488_v0  ;;  %v689_v3 = vadd.f32 %v688_v52, %v488_v0  ;;  %v742_v4 = vmul.f32 %v488_v0, %v488_v0  ;;  %v490_v6 = vpop.f32.mrb[30].mxu0  ;;  %636 = vst [vmem:[%s1373_s20 + $0x1e8] sm:$0xff] %v1523_v8  ;;  %v1535_v16 = vpop.f32.mrb[30].mxu1 }
 0x12b   : > { %v790_v9 = vadd.f32 %v789_v56, %v741_v63  ;;  %605 = vst [vmem:[%s1373_s20 + $0xf0] sm:$0xff] %v490_v6  ;;  %v653_v11 = vadd.f32 %v652_v61, %v490_v6  ;;  %v743_v13 = vmul.f32 %v490_v6, %v490_v6  ;;  %v492_v15 = vpop.f32.mrb[31].mxu0  ;;  %637 = vst [vmem:[%s1373_s20 + $0x1f0] sm:$0xff] %v1535_v16  ;;  %v1540_v22 = vpop.f32.mrb[31].mxu1 }
 0x12c   : > { %v827_v17 = vadd.f32 %v826_v59, %v742_v4  ;;  %606 = vst [vmem:[%s1373_s20 + $0xf8] sm:$0xff] %v492_v15  ;;  %v690_v19 = vadd.f32 %v689_v3, %v492_v15  ;;  %v744_v20 = vmul.f32 %v492_v15, %v492_v15  ;;  %638 = vst [vmem:[%s1373_s20 + $0x1f8] sm:$0xff] %v1540_v22 }
 0x12d   : > { %v654_v26 = vadd.f32 %v653_v11, %v1376_v27  ;;  %v791_v28 = vadd.f32 %v790_v9, %v743_v13 }
 0x12e   : > { %v691_v31 = vadd.f32 %v690_v19, %v1381_v29  ;;  %v828_v33 = vadd.f32 %v827_v17, %v744_v20 }
 0x12f   : > { %1144 = shalt.err (!%p1141_p3)
}
 0x130   : > { %s1145_s7 = scalar_lea.hbm %s1528_s28, 8192  ;;  %s1149_s10 = scalar_lea.hbm %s1714_s2, 16384 }
 0x131   : > { %p1146_p4 = scmp.ne.s32.totalorder %s1528_s28, %s1145_s7  ;;  %p1150_p9 = scmp.lt.u32.totalorder %s1528_s28, %s1714_s2 }
 0x132   : > { %p1151_p10 = scmp.lt.u32.totalorder %s1149_s10, %s1145_s7  ;;  %p1153_p12 = scmp.lt.u32.totalorder %s1145_s7, %s1528_s28 }
 0x133   : > { %p1147_p7 = pnand %p1146_p4, %p1290_p5 }
 0x134   : > { %p1152_p11 = por %p1151_p10, %p1150_p9 }
 0x135   : > { %p1148_p8 = pneg %p1147_p7 }
 0x136   : > { %p1154_p13 = por %p1153_p12, %p1152_p11 }
 0x138   : > { %p1155_p0 = pnand %p1154_p13, %p1148_p8 }
 0x13a   : > { %1158 = shalt.err (!%p1155_p0)
}
 0x13b   : > { %s1229_s20 = smov 256   ;;  %s1230_s24 = smov 16   ;;  %v747_v27 = vmul.f32 %v1386_v34, %v1386_v34  ;;  %v655_v29 = vadd.f32 %v654_v26, %v1386_v34  ;;  %v792_v36 = vadd.f32 %v791_v28, %v745_v24  ;;  %v748_v39 = vmul.f32 %v1391_v38, %v1391_v38 }
 0x13c   : > { %1060 = dma.vmem_to_hbm [thread:$0]  (%p1290_p5), %s1530_s25, 8192, %s1528_s28, %s867_s29, %s1229_s20, %s1229_s20, %s1230_s24   ;;  %v692_v40 = vadd.f32 %v691_v31, %v1391_v38  ;;  %v829_v42 = vadd.f32 %v828_v33, %v746_v30  ;;  %v749_v43 = vmul.f32 %v1396_v45, %v1396_v45  ;;  %v750_v50 = vmul.f32 %v1401_v49, %v1401_v49 }
 0x13d   : > { %v656_v44 = vadd.f32 %v655_v29, %v1396_v45  ;;  %v793_v47 = vadd.f32 %v792_v36, %v747_v27  ;;  %v751_v34 = vmul.f32 %v1406_v54, %v1406_v54  ;;  %v752_v38 = vmul.f32 %v1411_v58, %v1411_v58  ;;  %s999_s25 = sshll.u32 %s1370_s17, 2  ;;  %s1053_s26 = sshll.u32 %s1273_s16, 6 }
 0x13e   : > { %v693_v52 = vadd.f32 %v692_v40, %v1401_v49  ;;  %v830_v53 = vadd.f32 %v829_v42, %v748_v39  ;;  %v753_v45 = vmul.f32 %v1416_v1, %v1416_v1  ;;  %v754_v49 = vmul.f32 %v1421_v5, %v1421_v5  ;;  %s175_s27 = scalar_lea.vmem [#allocation4], %s999_s25  ;;  %s1669_s4 = scalar_lea.hbm %s1715_s3, %s1053_s26 }
 0x13f   : > { %v657_v56 = vadd.f32 %v656_v44, %v1406_v54  ;;  %v794_v59 = vadd.f32 %v793_v47, %v749_v43  ;;  %v755_v54 = vmul.f32 %v1426_v10, %v1426_v10  ;;  %v761_v31 = vmul.f32 %v1456_v46, %v1456_v46  ;;  %s903_s28 = sshll.u32 %s175_s27, 4  ;;  %s872_s5 = scalar_lea.sflag [#allocation5], %s1370_s17  ;;  %s1671_s28 = int_to_ptr.vmem [resolvable:$true] %s903_s28 }
 0x140   : > { %v694_v60 = vadd.f32 %v693_v52, %v1411_v58  ;;  %v831_v61 = vadd.f32 %v830_v53, %v750_v50  ;;  %v756_v58 = vmul.f32 %v1431_v14, %v1431_v14  ;;  %v762_v27 = vmul.f32 %v1461_v51, %v1461_v51  ;;  %s1159_s6 = scalar_lea.vmem %s1671_s28, 64  ;;  %s1231_s16 = smov [#allocation4]  }
 0x141   : > { %v795_v63 = vadd.f32 %v794_v59, %v751_v34  ;;  %v658_v0 = vadd.f32 %v657_v56, %v1416_v1  ;;  %v757_v1 = vmul.f32 %v1436_v21, %v1436_v21  ;;  %v763_v39 = vmul.f32 %v1466_v57, %v1466_v57  ;;  %p1160_p1 = scmp.ne.s32.totalorder %s1671_s28, %s1159_s6  ;;  %s1163_s7 = sshll.u32 %s1231_s16, 4  ;;  %s1164_s7 = int_to_ptr.vmem [resolvable:$false] %s1163_s7 }
 0x142   : > { %v832_v3 = vadd.f32 %v831_v61, %v752_v38  ;;  %v695_v4 = vadd.f32 %v694_v60, %v1421_v5  ;;  %v758_v5 = vmul.f32 %v1441_v25, %v1441_v25  ;;  %v764_v42 = vmul.f32 %v1471_v62, %v1471_v62  ;;  %s1165_s8 = scalar_lea.vmem %s1164_s7, 128  ;;  %p1166_p4 = scmp.lt.s32.totalorder %s1671_s28, %s1164_s7 }
 0x143   : > { %v659_v6 = vadd.f32 %v658_v0, %v1426_v10  ;;  %v796_v9 = vadd.f32 %v795_v63, %v753_v45  ;;  %v759_v10 = vmul.f32 %v1446_v32, %v1446_v32  ;;  %v765_v44 = vmul.f32 %v1476_v7, %v1476_v7  ;;  %p1161_p2 = pnand %p1160_p1, %p1290_p5  ;;  %p1167_p7 = scmp.lt.s32.totalorder %s1165_s8, %s1159_s6 }
 0x144   : > { %v696_v11 = vadd.f32 %v695_v4, %v1431_v14  ;;  %v833_v13 = vadd.f32 %v832_v3, %v754_v49  ;;  %v760_v14 = vmul.f32 %v1451_v37, %v1451_v37  ;;  %v766_v50 = vmul.f32 %v1481_v12, %v1481_v12 }
 0x145   : > { %v660_v15 = vadd.f32 %v659_v6, %v1436_v21  ;;  %v797_v17 = vadd.f32 %v796_v9, %v755_v54  ;;  %v767_v53 = vmul.f32 %v1486_v18, %v1486_v18  ;;  %v768_v56 = vmul.f32 %v1491_v23, %v1491_v23  ;;  %p1162_p3 = pneg %p1161_p2  ;;  %p1168_p8 = por %p1167_p7, %p1166_p4 }
 0x146   : > { %v697_v19 = vadd.f32 %v696_v11, %v1441_v25  ;;  %v834_v20 = vadd.f32 %v833_v13, %v756_v58  ;;  %v769_v38 = vmul.f32 %v1496_v35, %v1496_v35  ;;  %v770_v61 = vmul.f32 %v1501_v41, %v1501_v41 }
 0x147   : > { %v661_v24 = vadd.f32 %v660_v15, %v1446_v32  ;;  %v798_v26 = vadd.f32 %v797_v17, %v757_v1  ;;  %v771_v63 = vmul.f32 %v1506_v48, %v1506_v48  ;;  %v774_v3 = vmul.f32 %v1523_v8, %v1523_v8  ;;  %p1169_p9 = pnand %p1168_p8, %p1162_p3 }
 0x148   : > { %v698_v28 = vadd.f32 %v697_v19, %v1451_v37  ;;  %v835_v30 = vadd.f32 %v834_v20, %v758_v5  ;;  %v775_v58 = vmul.f32 %v1535_v16, %v1535_v16  ;;  %vm851_vm2 = vcmask 1040384  }
 0x149   : > { %v662_v21 = vadd.f32 %v661_v24, %v1456_v46  ;;  %v799_v33 = vadd.f32 %v798_v26, %v759_v10 }
 0x14a   : > { %v699_v25 = vadd.f32 %v698_v28, %v1461_v51  ;;  %v836_v29 = vadd.f32 %v835_v30, %v760_v14 }
 0x14b   : > { %v800_v32 = vadd.f32 %v799_v33, %v761_v31  ;;  %v663_v36 = vadd.f32 %v662_v21, %v1466_v57 }
 0x14c   : > { %v837_v37 = vadd.f32 %v836_v29, %v762_v27  ;;  %v700_v40 = vadd.f32 %v699_v25, %v1471_v62 }
 0x14d   : > { %v801_v46 = vadd.f32 %v800_v32, %v763_v39  ;;  %v664_v43 = vadd.f32 %v663_v36, %v1476_v7 }
 0x14e   : > { %v838_v51 = vadd.f32 %v837_v37, %v764_v42  ;;  %v701_v47 = vadd.f32 %v700_v40, %v1481_v12 }
 0x14f   : > { %v802_v52 = vadd.f32 %v801_v46, %v765_v44  ;;  %v665_v57 = vadd.f32 %v664_v43, %v1486_v18 }
 0x150   : > { %v839_v34 = vadd.f32 %v838_v51, %v766_v50  ;;  %v702_v62 = vadd.f32 %v701_v47, %v1491_v23  ;;  %v773_v23 = vmul.f32 %v1518_v2, %v1518_v2 }
 0x151   : > { %v803_v59 = vadd.f32 %v802_v52, %v767_v53  ;;  %v666_v7 = vadd.f32 %v665_v57, %v1496_v35  ;;  %v772_v35 = vmul.f32 %v1511_v55, %v1511_v55 }
 0x152   : > { %v840_v60 = vadd.f32 %v839_v34, %v768_v56  ;;  %v703_v12 = vadd.f32 %v702_v62, %v1501_v41 }
 0x153   : > { %v804_v45 = vadd.f32 %v803_v59, %v769_v38  ;;  %v667_v18 = vadd.f32 %v666_v7, %v1506_v48 }
 0x154   : > { %v841_v0 = vadd.f32 %v840_v60, %v770_v61  ;;  %v704_v49 = vadd.f32 %v703_v12, %v1511_v55  ;;  %v776_v55 = vmul.f32 %v1540_v22, %v1540_v22 }
 0x155   : > { %v805_v4 = vadd.f32 %v804_v45, %v771_v63  ;;  %v668_v41 = vadd.f32 %v667_v18, %v1518_v2 }
 0x156   : > { %v842_v54 = vadd.f32 %v841_v0, %v772_v35  ;;  %v705_v6 = vadd.f32 %v704_v49, %v1523_v8 }
 0x157   : > { %v806_v9 = vadd.f32 %v805_v4, %v773_v23  ;;  %v669_v48 = vadd.f32 %v668_v41, %v1535_v16 }
 0x158   : > { %v843_v11 = vadd.f32 %v842_v54, %v774_v3  ;;  %v706_v13 = vadd.f32 %v705_v6, %v1540_v22 }
 0x159   : > { %v670_v1 = vrot.slane %v669_v48, 4  ;;  %v807_v15 = vadd.f32 %v806_v9, %v775_v58 }
 0x15a   : > { %v707_v17 = vrot.slane %v706_v13, 4  ;;  %v844_v2 = vadd.f32 %v843_v11, %v776_v55 }
 0x15b   : > { %v671_v5 = vadd.f32 %v670_v1, %v669_v48  ;;  %v808_v19 = vrot.slane %v807_v15, 4 }
 0x15c   : > { %v708_v8 = vadd.f32 %v707_v17, %v706_v13  ;;  %v845_v20 = vrot.slane %v844_v2, 4 }
 0x15d   : > { %v672_v10 = vrot.slane %v671_v5, 2  ;;  %v809_v24 = vadd.f32 %v808_v19, %v807_v15 }
 0x15e   : > { %v709_v26 = vrot.slane %v708_v8, 2  ;;  %v846_v14 = vadd.f32 %v845_v20, %v844_v2 }
 0x15f   : > { %v673_v16 = vadd.f32 %v672_v10, %v671_v5  ;;  %v810_v28 = vrot.slane %v809_v24, 2 }
 0x160   : > { %v710_v30 = vadd.f32 %v709_v26, %v708_v8  ;;  %v847_v21 = vrot.slane %v846_v14, 2 }
 0x161   : > { %v674_v22 = vrot.slane %v673_v16, 1  ;;  %v811_v31 = vadd.f32 %v810_v28, %v809_v24 }
 0x162   : > { %v711_v33 = vrot.slane %v710_v30, 1  ;;  %v848_v25 = vadd.f32 %v847_v21, %v846_v14 }
 0x163   : > { %v812_v27 = vrot.slane %v811_v31, 1  ;;  %v675_v32 = vadd.f32 %v674_v22, %v673_v16 }
 0x164   : > { %v849_v29 = vrot.slane %v848_v25, 1  ;;  %v712_v39 = vadd.f32 %v711_v33, %v710_v30 }
 0x165   : > { %v813_v36 = vadd.f32 %v812_v27, %v811_v31 }
 0x166   : > { %v850_v37 = vadd.f32 %v849_v29, %v848_v25 }
 0x167   : > { %v852_v40 = vsel %vm851_vm2, %v675_v32, %v813_v36 }
 0x168   : > { %v853_v42 = vsel %vm851_vm2, %v712_v39, %v850_v37 }
 0x169   : > { %v856_v46 = vcombine.low %v852_v40, %v853_v42 }
 0x16b   : > { %1041 = vst.sshfl [vmem:[%s175_s27] sm:$0x33 pattern:$0x76325410] %v856_v46 }
 0x16c   : > { %1172 = shalt.err (!%p1169_p9)
}
 0x16d   : > { %s1173_s17 = scalar_lea.hbm %s1669_s4, 64  ;;  %s1177_s11 = scalar_lea.hbm %s1715_s3, 128 }
 0x16e   : > { %p1174_p10 = scmp.ne.s32.totalorder %s1669_s4, %s1173_s17  ;;  %p1178_p13 = scmp.lt.u32.totalorder %s1669_s4, %s1715_s3 }
 0x16f   : > { %p1179_p0 = scmp.lt.u32.totalorder %s1177_s11, %s1173_s17  ;;  %p1181_p2 = scmp.lt.u32.totalorder %s1173_s17, %s1669_s4 }
 0x170   : > { %p1175_p11 = pnand %p1174_p10, %p1290_p5 }
 0x171   : > { %p1180_p1 = por %p1179_p0, %p1178_p13 }
 0x172   : > { %p1176_p12 = pneg %p1175_p11 }
 0x173   : > { %p1182_p3 = por %p1181_p2, %p1180_p1 }
 0x175   : > { %p1183_p4 = pnand %p1182_p3, %p1176_p12 }
 0x177   : > { %1186 = shalt.err (!%p1183_p4)
}
 0x178   : > { %1061 = dma.vmem_to_hbm [thread:$0]  (%p1290_p5), %s1671_s28, 64, %s1669_s4, %s872_s5  }
 0x179 PF: > { %p1071_p7 = scmp.ge.s32.totalorder %s1225_s15, 2  ;;  %s915_s24 = sand.u32 1, %s1213_s12  }
 0x17a   : > { %s916_s25 = scalar_lea.sflag [#allocation3], %s915_s24 }
 0x17b   : > { %p1065_p8 = pnand %p1071_p7, %p1294_p6 }
 0x17d   : > { %1204 = dma.done.wait (!%p1065_p8), %s916_s25, 8192  }
 0x17e   : > { %1206 = vsyncadd (!%p1065_p8), %s916_s25, 4294959104  ;;  %s925_s26 = scalar_lea.sflag [#allocation5], %s915_s24 }
 0x17f   : > { %1208 = dma.done.wait (!%p1065_p8), %s925_s26, 64  }
 0x180   : > { %1210 = vsyncadd (!%p1065_p8), %s925_s26, 4294967232  ;;  %p17_p5 = scmp.ge.s32.totalorder %s1277_s18, 4   ;;  %s1718_s12 = smov %s1217_s13 }
 0x181   : > { %s1719_s13 = smov %s1221_s14  ;;  %s1720_s14 = smov %s1288_s21 }
 0x182   : > { %s1721_s15 = smov %s1277_s18  ;;  %19 = sbr.rel (!%p17_p5) target bundleno = 5 (0x5), region = 80 }
 0x189   :  { %930 = vsyncpa [#allocation3], 1 }
 0x18a   :  { %932 = vsyncpa [#allocation3 + $0x1], 1 }
 0x18b   :  { %933 = vsyncpa [#allocation5], 1 }
 0x18c   :  { %935 = vsyncpa [#allocation5 + $0x1], 1 }

</bundles_post_ra>
